<compile_context>
chip_gen: v6e
topology: v6e:2x2x1
jax: 0.10.0
libtpu: 0.0.40
codegen_flags: <defaults>
</compile_context>

<pallas_src>
import jax
import jax.numpy as jnp
import numpy as np
from jax import lax
from jax.experimental import pallas as pl
from jax.experimental.pallas import tpu as pltpu

STATE_DIM = 16
H1, H2 = 64, 32          # hidden_size=(64, 32) as in the PyTorch module
G = 4 * H2               # 128 LSTM gate lanes
LANES = 128
B, T = 8, 8              # small test shapes

# Static layout assumptions (review robustness note): error loudly instead of
# silently misaligning packed slices if sizes ever change.
assert G == LANES, "slab layout assumes 4*hidden2 == 128"
assert H1 <= LANES and STATE_DIM <= LANES
assert 2 * H2 + T <= LANES, "output slab packs [h | c | v(T)] into 128 lanes"
assert B % 8 == 0 and (T * B) % 8 == 0, "sublane-aligned row sections"


def _r8(n):
    return ((n + 7) // 8) * 8


# Row offsets of each parameter inside the packed (P_ROWS, 128) fp32 slab.
# Every section starts on a sublane (8-row) boundary.
R_W1 = 0                          # fc1.weight^T  rows [0,128): rows 0:D real, cols 0:H1 real
R_B1 = R_W1 + LANES               # fc1.bias      row 128, cols [0,H1)
R_WIH = _r8(R_B1 + 1)             # lstm.weight_ih^T rows [136,264): rows 136:200 real
R_WHH = R_WIH + LANES             # lstm.weight_hh^T rows [264,296)
R_BL = R_WHH + H2                 # bias_ih + bias_hh, row 296
R_WV = _r8(R_BL + 1)              # value_head: row 304, cols [0,H2) weight, col H2 bias
P_ROWS = _r8(R_WV + 1)            # 312  (~156 KiB fp32)

# Output slab column offsets.
C_H, C_C, C_V = 0, H2, 2 * H2


def critic_kernel(din_ref, p_ref, out_ref):
    TB = T * B

    # ---- static slices of the packed parameter slab (all 8-row aligned) ----
    w1 = p_ref[R_W1:R_W1 + LANES, :]            # (128, 128) rows D:128 & cols H1:128 zero
    b1 = p_ref[R_B1:R_B1 + 1, :]                # (1, 128)   cols H1:128 zero
    wih = p_ref[R_WIH:R_WIH + LANES, :]         # (128, 128) rows H1:128 zero
    whh = p_ref[R_WHH:R_WHH + H2, :]            # (H2, 128)
    blstm = p_ref[R_BL:R_BL + 1, :]             # (1, 128)   = bias_ih + bias_hh
    wv = p_ref[R_WV:R_WV + 1, 0:H2]             # (1, H2)    value_head weight row
    bv = p_ref[R_WV:R_WV + 1, H2:H2 + 1]        # (1, 1)     value_head bias

    # ---- unpack the merged data slab ----
    x = din_ref[0:TB, :]                        # (T*B, 128), cols D:128 zero
    hc0 = din_ref[TB:TB + B, :]                 # (B, 128)
    h = hc0[:, 0:H2]                            # (B, H2)
    c = hc0[:, H2:2 * H2]                       # (B, H2)

    # ---- fc1 + ReLU for all timesteps at once, K=128 aligned MXU feed ----
    a = jnp.maximum(
        jnp.dot(x, w1, preferred_element_type=jnp.float32) + b1, 0.0)   # (T*B, 128)

    # ---- input->hidden projection for all timesteps, K=128 ----
    zin = jnp.dot(a, wih, preferred_element_type=jnp.float32) + blstm   # (T*B, 128)

    # ---- fully unrolled recurrence (PyTorch gate order i, f, g, o) ----
    v_cols = []
    for t in range(T):                          # T is a compile-time constant
        z = zin[t * B:(t + 1) * B, :] + jnp.dot(
            h, whh, preferred_element_type=jnp.float32)                 # (B, 128)
        # sigmoid(z) == 0.5 * (tanh(z/2) + 1): one EUP push instead of exp+recip
        sig_z = 0.5 * (jnp.tanh(0.5 * z) + 1.0)
        tanh_z = jnp.tanh(z)
        i = sig_z[:, 0:H2]
        f = sig_z[:, H2:2 * H2]
        g = tanh_z[:, 2 * H2:3 * H2]
        o = sig_z[:, 3 * H2:4 * H2]
        c = f * c + i * g
        h = o * jnp.tanh(c)
        # value head folded into the loop: VPU multiply + lane reduce (free
        # filler under the next step's MXU latency).
        v_cols.append(jnp.sum(h * wv, axis=-1, keepdims=True) + bv)     # (B, 1)

    # ---- single unmasked full-lane store: [h_n | c_n | v(B,T) | 0-pad] ----
    v_bt = jnp.concatenate(v_cols, axis=-1)                             # (B, T)
    pad = jnp.zeros((B, LANES - 2 * H2 - T), jnp.float32)
    out_ref[...] = jnp.concatenate([h, c, v_bt, pad], axis=-1)          # (B, 128)


def init_params(key, state_dim=STATE_DIM, hidden=(H1, H2)):
    """Deterministic synthetic init mirroring the PyTorch Critic.init()."""
    h1, h2 = hidden
    k1, k2, k3, k4 = jax.random.split(key, 4)

    def kaiming(k, shape, fan_in):
        return jax.random.normal(k, shape, jnp.float32) * jnp.sqrt(2.0 / fan_in)

    def orthogonal(k, shape):
        a = jax.random.normal(k, shape, jnp.float32)
        q, r = jnp.linalg.qr(a)
        return q * jnp.sign(jnp.diag(r))  # sign-fix like torch.nn.init.orthogonal_

    return dict(
        w1=kaiming(k1, (h1, state_dim), state_dim),      # fc1.weight
        b1=jnp.zeros((h1,), jnp.float32),                # fc1.bias
        wih=orthogonal(k2, (4 * h2, h1)),                # lstm.weight_ih_l0
        whh=orthogonal(k3, (4 * h2, h2)),                # lstm.weight_hh_l0
        bih=jnp.ones((4 * h2,), jnp.float32),            # lstm.bias_ih_l0
        bhh=jnp.ones((4 * h2,), jnp.float32),            # lstm.bias_hh_l0
        wv=kaiming(k4, (1, h2), h2),                     # value_head.weight
        bv=jnp.zeros((1,), jnp.float32),                 # value_head.bias
    )


def pack_params(params):
    """Pack all weights/biases into one (P_ROWS, 128) fp32 slab.

    Called ONCE (hoisted out of the per-step rollout path); the slab is then
    passed to critic_forward as a plain array.
    """
    slab = jnp.zeros((P_ROWS, LANES), jnp.float32)
    slab = slab.at[R_W1:R_W1 + STATE_DIM, 0:H1].set(params["w1"].T)
    slab = slab.at[R_B1, 0:H1].set(params["b1"])
    slab = slab.at[R_WIH:R_WIH + H1, :].set(params["wih"].T)
    slab = slab.at[R_WHH:R_WHH + H2, :].set(params["whh"].T)
    slab = slab.at[R_BL, :].set(params["bih"] + params["bhh"])
    slab = slab.at[R_WV, 0:H2].set(params["wv"][0])
    slab = slab.at[R_WV, H2].set(params["bv"][0])
    return slab


@jax.jit
def critic_forward(pslab, x, hidden):
    """pslab: packed (P_ROWS, 128) params; x: (B, T, state_dim);
    hidden = (h0, c0), each (1, B, H2).  Returns (v, (h_n, c_n)) like PyTorch."""
    h0, c0 = hidden
    Bb, Tt, D = x.shape

    # Merge x (time-major, flattened, lane-padded) and [h0|c0] into one
    # lane-dense (T*B + B, 128) slab -> a single unmasked input DMA.
    x_tm = jnp.transpose(x, (1, 0, 2)).astype(jnp.float32).reshape(Tt * Bb, D)
    x_pad = jnp.concatenate(
        [x_tm, jnp.zeros((Tt * Bb, LANES - D), jnp.float32)], axis=-1)
    hc0 = jnp.concatenate(
        [h0[0].astype(jnp.float32), c0[0].astype(jnp.float32),
         jnp.zeros((Bb, LANES - 2 * H2), jnp.float32)], axis=-1)
    din = jnp.concatenate([x_pad, hc0], axis=0)             # (T*B + B, 128)

    vmem = pl.BlockSpec(memory_space=pltpu.MemorySpace.VMEM)
    # NOTE: at B=8/T=8 a grid-less single invocation is cheapest on all of
    # v5e/v6e/v7x (VMEM use ~0.2 MiB, recurrence latency-bound).  For larger
    # batches, grow B in this same call (the per-step (B,H2)@(H2,128) matmul
    # uses a tiny fraction of the MXU); on v7x only shard B across the 2
    # TensorCores (grid over B, dimension_semantics=("parallel",)) once
    # B per core >= 8.
    out = pl.pallas_call(
        critic_kernel,
        out_shape=jax.ShapeDtypeStruct((Bb, LANES), jnp.float32),
        in_specs=[vmem, vmem],
        out_specs=vmem,
    )(din, pslab)

    v = out[:, C_V:C_V + Tt][:, :, None]                    # (B, T, 1) batch-first
    hn = out[:, C_H:C_H + H2][None]                         # (1, B, H2)
    cn = out[:, C_C:C_C + H2][None]                         # (1, B, H2)
    return v, (hn, cn)


def critic_ref(params, x, hidden):
    """Pure-JAX reference for validation."""
    h0, c0 = hidden
    a = jax.nn.relu(jnp.einsum("btd,hd->bth", x, params["w1"]) + params["b1"])
    zin = jnp.einsum("bth,gh->btg", a, params["wih"]) + params["bih"] + params["bhh"]

    def step(carry, z_t):
        h, c = carry
        z = z_t + h @ params["whh"].T
        i = jax.nn.sigmoid(z[:, 0:H2])
        f = jax.nn.sigmoid(z[:, H2:2 * H2])
        g = jnp.tanh(z[:, 2 * H2:3 * H2])
        o = jax.nn.sigmoid(z[:, 3 * H2:4 * H2])
        c = f * c + i * g
        h = o * jnp.tanh(c)
        return (h, c), h

    (hT, cT), hs = lax.scan(step, (h0[0], c0[0]), jnp.transpose(zin, (1, 0, 2)))
    hs = jnp.transpose(hs, (1, 0, 2))                            # (B, T, H2)
    v = jnp.einsum("bth,oh->bto", hs, params["wv"]) + params["bv"]
    return v, (hT[None], cT[None])


if __name__ == "__main__":
    key = jax.random.PRNGKey(0)
    kp, kx, kh, kc = jax.random.split(key, 4)
    params = init_params(kp)
    pslab = jax.block_until_ready(pack_params(params))   # packed once, off the hot path

    x = jax.random.normal(kx, (B, T, STATE_DIM), jnp.float32)
    h0 = jax.random.normal(kh, (1, B, H2), jnp.float32) * 0.1
    c0 = jax.random.normal(kc, (1, B, H2), jnp.float32) * 0.1

    v, (hn, cn) = critic_forward(pslab, x, (h0, c0))
    jax.block_until_ready((v, hn, cn))

    v_ref, (hn_ref, cn_ref) = critic_ref(params, x, (h0, c0))
    np.testing.assert_allclose(np.asarray(v), np.asarray(v_ref), rtol=1e-4, atol=1e-4)
    np.testing.assert_allclose(np.asarray(hn), np.asarray(hn_ref), rtol=1e-4, atol=1e-4)
    np.testing.assert_allclose(np.asarray(cn), np.asarray(cn_ref), rtol=1e-4, atol=1e-4)

    assert v.shape == (B, T, 1) and hn.shape == (1, B, H2) and cn.shape == (1, B, H2)
    print("KERNEL_OK")
</pallas_src>

<mosaic_0001>
module attributes {stable_mosaic.version = 11 : i64} {
  func.func @critic_kernel(%arg0: memref<72x128xf32, #tpu.memory_space<vmem>>, %arg1: memref<312x128xf32, #tpu.memory_space<vmem>>, %arg2: memref<8x128xf32, #tpu.memory_space<vmem>>) attributes {dimension_semantics = [], scalar_prefetch = 0 : i64, scratch_operands = 0 : i64, tpu.core_type = #tpu.core_type<tc>} {
    %c0 = arith.constant 0 : index
    %c0_0 = arith.constant 0 : index
    %0 = vector.load %arg1[%c0, %c0_0] : memref<312x128xf32, #tpu.memory_space<vmem>>, vector<128x128xf32>
    %c128 = arith.constant 128 : index
    %c0_1 = arith.constant 0 : index
    %1 = vector.load %arg1[%c128, %c0_1] : memref<312x128xf32, #tpu.memory_space<vmem>>, vector<1x128xf32>
    %c136 = arith.constant 136 : index
    %c0_2 = arith.constant 0 : index
    %2 = vector.load %arg1[%c136, %c0_2] : memref<312x128xf32, #tpu.memory_space<vmem>>, vector<128x128xf32>
    %c264 = arith.constant 264 : index
    %c0_3 = arith.constant 0 : index
    %3 = vector.load %arg1[%c264, %c0_3] : memref<312x128xf32, #tpu.memory_space<vmem>>, vector<32x128xf32>
    %c296 = arith.constant 296 : index
    %c0_4 = arith.constant 0 : index
    %4 = vector.load %arg1[%c296, %c0_4] : memref<312x128xf32, #tpu.memory_space<vmem>>, vector<1x128xf32>
    %c304 = arith.constant 304 : index
    %c0_5 = arith.constant 0 : index
    %5 = vector.load %arg1[%c304, %c0_5] : memref<312x128xf32, #tpu.memory_space<vmem>>, vector<1x32xf32>
    %c304_6 = arith.constant 304 : index
    %c32 = arith.constant 32 : index
    %6 = vector.load %arg1[%c304_6, %c32] : memref<312x128xf32, #tpu.memory_space<vmem>>, vector<1x1xf32>
    %c0_7 = arith.constant 0 : index
    %c0_8 = arith.constant 0 : index
    %7 = vector.load %arg0[%c0_7, %c0_8] : memref<72x128xf32, #tpu.memory_space<vmem>>, vector<64x128xf32>
    %c64 = arith.constant 64 : index
    %c0_9 = arith.constant 0 : index
    %8 = vector.load %arg0[%c64, %c0_9] : memref<72x128xf32, #tpu.memory_space<vmem>>, vector<8x128xf32>
    %9 = vector.extract_strided_slice %8 {offsets = [0, 0], sizes = [8, 32], strides = [1, 1]} : vector<8x128xf32> to vector<8x32xf32>
    %10 = vector.extract_strided_slice %8 {offsets = [0, 32], sizes = [8, 32], strides = [1, 1]} : vector<8x128xf32> to vector<8x32xf32>
    %cst = arith.constant dense<0.000000e+00> : vector<64x128xf32>
    %11 = tpu.matmul %7, %0, %cst {dimension_numbers = #tpu.dot_dimension_numbers<[1], [0], [0], [1], [0, 0, 1, 1], [], []>} : vector<64x128xf32>, vector<128x128xf32>, vector<64x128xf32> -> vector<64x128xf32>
    %12 = vector.broadcast %1 : vector<1x128xf32> to vector<64x128xf32>
    %13 = arith.addf %11, %12 : vector<64x128xf32>
    %cst_10 = arith.constant 0.000000e+00 : f32
    %14 = vector.broadcast %cst_10 : f32 to vector<64x128xf32>
    %15 = arith.maximumf %13, %14 : vector<64x128xf32>
    %cst_11 = arith.constant dense<0.000000e+00> : vector<64x128xf32>
    %16 = tpu.matmul %15, %2, %cst_11 {dimension_numbers = #tpu.dot_dimension_numbers<[1], [0], [0], [1], [0, 0, 1, 1], [], []>} : vector<64x128xf32>, vector<128x128xf32>, vector<64x128xf32> -> vector<64x128xf32>
    %17 = vector.broadcast %4 : vector<1x128xf32> to vector<64x128xf32>
    %18 = arith.addf %16, %17 : vector<64x128xf32>
    %19 = vector.extract_strided_slice %18 {offsets = [0, 0], sizes = [8, 128], strides = [1, 1]} : vector<64x128xf32> to vector<8x128xf32>
    %cst_12 = arith.constant dense<0.000000e+00> : vector<8x128xf32>
    %20 = tpu.matmul %9, %3, %cst_12 {dimension_numbers = #tpu.dot_dimension_numbers<[1], [0], [0], [1], [0, 0, 1, 1], [], []>} : vector<8x32xf32>, vector<32x128xf32>, vector<8x128xf32> -> vector<8x128xf32>
    %21 = arith.addf %19, %20 : vector<8x128xf32>
    %cst_13 = arith.constant 5.000000e-01 : f32
    %22 = vector.broadcast %cst_13 : f32 to vector<8x128xf32>
    %23 = arith.mulf %22, %21 : vector<8x128xf32>
    %24 = math.tanh %23 : vector<8x128xf32>
    %cst_14 = arith.constant 1.000000e+00 : f32
    %25 = vector.broadcast %cst_14 : f32 to vector<8x128xf32>
    %26 = arith.addf %24, %25 : vector<8x128xf32>
    %cst_15 = arith.constant 5.000000e-01 : f32
    %27 = vector.broadcast %cst_15 : f32 to vector<8x128xf32>
    %28 = arith.mulf %27, %26 : vector<8x128xf32>
    %29 = math.tanh %21 : vector<8x128xf32>
    %30 = vector.extract_strided_slice %28 {offsets = [0, 0], sizes = [8, 32], strides = [1, 1]} : vector<8x128xf32> to vector<8x32xf32>
    %31 = vector.extract_strided_slice %28 {offsets = [0, 32], sizes = [8, 32], strides = [1, 1]} : vector<8x128xf32> to vector<8x32xf32>
    %32 = vector.extract_strided_slice %29 {offsets = [0, 64], sizes = [8, 32], strides = [1, 1]} : vector<8x128xf32> to vector<8x32xf32>
    %33 = vector.extract_strided_slice %28 {offsets = [0, 96], sizes = [8, 32], strides = [1, 1]} : vector<8x128xf32> to vector<8x32xf32>
    %34 = arith.mulf %31, %10 : vector<8x32xf32>
    %35 = arith.mulf %30, %32 : vector<8x32xf32>
    %36 = arith.addf %34, %35 : vector<8x32xf32>
    %37 = math.tanh %36 : vector<8x32xf32>
    %38 = arith.mulf %33, %37 : vector<8x32xf32>
    %39 = vector.broadcast %5 : vector<1x32xf32> to vector<8x32xf32>
    %40 = arith.mulf %38, %39 : vector<8x32xf32>
    %cst_16 = arith.constant dense<0.000000e+00> : vector<8xf32>
    %41 = vector.multi_reduction <add>, %40, %cst_16 [1] : vector<8x32xf32> to vector<8xf32>
    %42 = vector.shape_cast %41 : vector<8xf32> to vector<8x1xf32>
    %43 = vector.broadcast %6 : vector<1x1xf32> to vector<8x1xf32>
    %44 = arith.addf %42, %43 : vector<8x1xf32>
    %45 = vector.extract_strided_slice %18 {offsets = [8, 0], sizes = [8, 128], strides = [1, 1]} : vector<64x128xf32> to vector<8x128xf32>
    %cst_17 = arith.constant dense<0.000000e+00> : vector<8x128xf32>
    %46 = tpu.matmul %38, %3, %cst_17 {dimension_numbers = #tpu.dot_dimension_numbers<[1], [0], [0], [1], [0, 0, 1, 1], [], []>} : vector<8x32xf32>, vector<32x128xf32>, vector<8x128xf32> -> vector<8x128xf32>
    %47 = arith.addf %45, %46 : vector<8x128xf32>
    %cst_18 = arith.constant 5.000000e-01 : f32
    %48 = vector.broadcast %cst_18 : f32 to vector<8x128xf32>
    %49 = arith.mulf %48, %47 : vector<8x128xf32>
    %50 = math.tanh %49 : vector<8x128xf32>
    %cst_19 = arith.constant 1.000000e+00 : f32
    %51 = vector.broadcast %cst_19 : f32 to vector<8x128xf32>
    %52 = arith.addf %50, %51 : vector<8x128xf32>
    %cst_20 = arith.constant 5.000000e-01 : f32
    %53 = vector.broadcast %cst_20 : f32 to vector<8x128xf32>
    %54 = arith.mulf %53, %52 : vector<8x128xf32>
    %55 = math.tanh %47 : vector<8x128xf32>
    %56 = vector.extract_strided_slice %54 {offsets = [0, 0], sizes = [8, 32], strides = [1, 1]} : vector<8x128xf32> to vector<8x32xf32>
    %57 = vector.extract_strided_slice %54 {offsets = [0, 32], sizes = [8, 32], strides = [1, 1]} : vector<8x128xf32> to vector<8x32xf32>
    %58 = vector.extract_strided_slice %55 {offsets = [0, 64], sizes = [8, 32], strides = [1, 1]} : vector<8x128xf32> to vector<8x32xf32>
    %59 = vector.extract_strided_slice %54 {offsets = [0, 96], sizes = [8, 32], strides = [1, 1]} : vector<8x128xf32> to vector<8x32xf32>
    %60 = arith.mulf %57, %36 : vector<8x32xf32>
    %61 = arith.mulf %56, %58 : vector<8x32xf32>
    %62 = arith.addf %60, %61 : vector<8x32xf32>
    %63 = math.tanh %62 : vector<8x32xf32>
    %64 = arith.mulf %59, %63 : vector<8x32xf32>
    %65 = vector.broadcast %5 : vector<1x32xf32> to vector<8x32xf32>
    %66 = arith.mulf %64, %65 : vector<8x32xf32>
    %cst_21 = arith.constant dense<0.000000e+00> : vector<8xf32>
    %67 = vector.multi_reduction <add>, %66, %cst_21 [1] : vector<8x32xf32> to vector<8xf32>
    %68 = vector.shape_cast %67 : vector<8xf32> to vector<8x1xf32>
    %69 = vector.broadcast %6 : vector<1x1xf32> to vector<8x1xf32>
    %70 = arith.addf %68, %69 : vector<8x1xf32>
    %71 = vector.extract_strided_slice %18 {offsets = [16, 0], sizes = [8, 128], strides = [1, 1]} : vector<64x128xf32> to vector<8x128xf32>
    %cst_22 = arith.constant dense<0.000000e+00> : vector<8x128xf32>
    %72 = tpu.matmul %64, %3, %cst_22 {dimension_numbers = #tpu.dot_dimension_numbers<[1], [0], [0], [1], [0, 0, 1, 1], [], []>} : vector<8x32xf32>, vector<32x128xf32>, vector<8x128xf32> -> vector<8x128xf32>
    %73 = arith.addf %71, %72 : vector<8x128xf32>
    %cst_23 = arith.constant 5.000000e-01 : f32
    %74 = vector.broadcast %cst_23 : f32 to vector<8x128xf32>
    %75 = arith.mulf %74, %73 : vector<8x128xf32>
    %76 = math.tanh %75 : vector<8x128xf32>
    %cst_24 = arith.constant 1.000000e+00 : f32
    %77 = vector.broadcast %cst_24 : f32 to vector<8x128xf32>
    %78 = arith.addf %76, %77 : vector<8x128xf32>
    %cst_25 = arith.constant 5.000000e-01 : f32
    %79 = vector.broadcast %cst_25 : f32 to vector<8x128xf32>
    %80 = arith.mulf %79, %78 : vector<8x128xf32>
    %81 = math.tanh %73 : vector<8x128xf32>
    %82 = vector.extract_strided_slice %80 {offsets = [0, 0], sizes = [8, 32], strides = [1, 1]} : vector<8x128xf32> to vector<8x32xf32>
    %83 = vector.extract_strided_slice %80 {offsets = [0, 32], sizes = [8, 32], strides = [1, 1]} : vector<8x128xf32> to vector<8x32xf32>
    %84 = vector.extract_strided_slice %81 {offsets = [0, 64], sizes = [8, 32], strides = [1, 1]} : vector<8x128xf32> to vector<8x32xf32>
    %85 = vector.extract_strided_slice %80 {offsets = [0, 96], sizes = [8, 32], strides = [1, 1]} : vector<8x128xf32> to vector<8x32xf32>
    %86 = arith.mulf %83, %62 : vector<8x32xf32>
    %87 = arith.mulf %82, %84 : vector<8x32xf32>
    %88 = arith.addf %86, %87 : vector<8x32xf32>
    %89 = math.tanh %88 : vector<8x32xf32>
    %90 = arith.mulf %85, %89 : vector<8x32xf32>
    %91 = vector.broadcast %5 : vector<1x32xf32> to vector<8x32xf32>
    %92 = arith.mulf %90, %91 : vector<8x32xf32>
    %cst_26 = arith.constant dense<0.000000e+00> : vector<8xf32>
    %93 = vector.multi_reduction <add>, %92, %cst_26 [1] : vector<8x32xf32> to vector<8xf32>
    %94 = vector.shape_cast %93 : vector<8xf32> to vector<8x1xf32>
    %95 = vector.broadcast %6 : vector<1x1xf32> to vector<8x1xf32>
    %96 = arith.addf %94, %95 : vector<8x1xf32>
    %97 = vector.extract_strided_slice %18 {offsets = [24, 0], sizes = [8, 128], strides = [1, 1]} : vector<64x128xf32> to vector<8x128xf32>
    %cst_27 = arith.constant dense<0.000000e+00> : vector<8x128xf32>
    %98 = tpu.matmul %90, %3, %cst_27 {dimension_numbers = #tpu.dot_dimension_numbers<[1], [0], [0], [1], [0, 0, 1, 1], [], []>} : vector<8x32xf32>, vector<32x128xf32>, vector<8x128xf32> -> vector<8x128xf32>
    %99 = arith.addf %97, %98 : vector<8x128xf32>
    %cst_28 = arith.constant 5.000000e-01 : f32
    %100 = vector.broadcast %cst_28 : f32 to vector<8x128xf32>
    %101 = arith.mulf %100, %99 : vector<8x128xf32>
    %102 = math.tanh %101 : vector<8x128xf32>
    %cst_29 = arith.constant 1.000000e+00 : f32
    %103 = vector.broadcast %cst_29 : f32 to vector<8x128xf32>
    %104 = arith.addf %102, %103 : vector<8x128xf32>
    %cst_30 = arith.constant 5.000000e-01 : f32
    %105 = vector.broadcast %cst_30 : f32 to vector<8x128xf32>
    %106 = arith.mulf %105, %104 : vector<8x128xf32>
    %107 = math.tanh %99 : vector<8x128xf32>
    %108 = vector.extract_strided_slice %106 {offsets = [0, 0], sizes = [8, 32], strides = [1, 1]} : vector<8x128xf32> to vector<8x32xf32>
    %109 = vector.extract_strided_slice %106 {offsets = [0, 32], sizes = [8, 32], strides = [1, 1]} : vector<8x128xf32> to vector<8x32xf32>
    %110 = vector.extract_strided_slice %107 {offsets = [0, 64], sizes = [8, 32], strides = [1, 1]} : vector<8x128xf32> to vector<8x32xf32>
    %111 = vector.extract_strided_slice %106 {offsets = [0, 96], sizes = [8, 32], strides = [1, 1]} : vector<8x128xf32> to vector<8x32xf32>
    %112 = arith.mulf %109, %88 : vector<8x32xf32>
    %113 = arith.mulf %108, %110 : vector<8x32xf32>
    %114 = arith.addf %112, %113 : vector<8x32xf32>
    %115 = math.tanh %114 : vector<8x32xf32>
    %116 = arith.mulf %111, %115 : vector<8x32xf32>
    %117 = vector.broadcast %5 : vector<1x32xf32> to vector<8x32xf32>
    %118 = arith.mulf %116, %117 : vector<8x32xf32>
    %cst_31 = arith.constant dense<0.000000e+00> : vector<8xf32>
    %119 = vector.multi_reduction <add>, %118, %cst_31 [1] : vector<8x32xf32> to vector<8xf32>
    %120 = vector.shape_cast %119 : vector<8xf32> to vector<8x1xf32>
    %121 = vector.broadcast %6 : vector<1x1xf32> to vector<8x1xf32>
    %122 = arith.addf %120, %121 : vector<8x1xf32>
    %123 = vector.extract_strided_slice %18 {offsets = [32, 0], sizes = [8, 128], strides = [1, 1]} : vector<64x128xf32> to vector<8x128xf32>
    %cst_32 = arith.constant dense<0.000000e+00> : vector<8x128xf32>
    %124 = tpu.matmul %116, %3, %cst_32 {dimension_numbers = #tpu.dot_dimension_numbers<[1], [0], [0], [1], [0, 0, 1, 1], [], []>} : vector<8x32xf32>, vector<32x128xf32>, vector<8x128xf32> -> vector<8x128xf32>
    %125 = arith.addf %123, %124 : vector<8x128xf32>
    %cst_33 = arith.constant 5.000000e-01 : f32
    %126 = vector.broadcast %cst_33 : f32 to vector<8x128xf32>
    %127 = arith.mulf %126, %125 : vector<8x128xf32>
    %128 = math.tanh %127 : vector<8x128xf32>
    %cst_34 = arith.constant 1.000000e+00 : f32
    %129 = vector.broadcast %cst_34 : f32 to vector<8x128xf32>
    %130 = arith.addf %128, %129 : vector<8x128xf32>
    %cst_35 = arith.constant 5.000000e-01 : f32
    %131 = vector.broadcast %cst_35 : f32 to vector<8x128xf32>
    %132 = arith.mulf %131, %130 : vector<8x128xf32>
    %133 = math.tanh %125 : vector<8x128xf32>
    %134 = vector.extract_strided_slice %132 {offsets = [0, 0], sizes = [8, 32], strides = [1, 1]} : vector<8x128xf32> to vector<8x32xf32>
    %135 = vector.extract_strided_slice %132 {offsets = [0, 32], sizes = [8, 32], strides = [1, 1]} : vector<8x128xf32> to vector<8x32xf32>
    %136 = vector.extract_strided_slice %133 {offsets = [0, 64], sizes = [8, 32], strides = [1, 1]} : vector<8x128xf32> to vector<8x32xf32>
    %137 = vector.extract_strided_slice %132 {offsets = [0, 96], sizes = [8, 32], strides = [1, 1]} : vector<8x128xf32> to vector<8x32xf32>
    %138 = arith.mulf %135, %114 : vector<8x32xf32>
    %139 = arith.mulf %134, %136 : vector<8x32xf32>
    %140 = arith.addf %138, %139 : vector<8x32xf32>
    %141 = math.tanh %140 : vector<8x32xf32>
    %142 = arith.mulf %137, %141 : vector<8x32xf32>
    %143 = vector.broadcast %5 : vector<1x32xf32> to vector<8x32xf32>
    %144 = arith.mulf %142, %143 : vector<8x32xf32>
    %cst_36 = arith.constant dense<0.000000e+00> : vector<8xf32>
    %145 = vector.multi_reduction <add>, %144, %cst_36 [1] : vector<8x32xf32> to vector<8xf32>
    %146 = vector.shape_cast %145 : vector<8xf32> to vector<8x1xf32>
    %147 = vector.broadcast %6 : vector<1x1xf32> to vector<8x1xf32>
    %148 = arith.addf %146, %147 : vector<8x1xf32>
    %149 = vector.extract_strided_slice %18 {offsets = [40, 0], sizes = [8, 128], strides = [1, 1]} : vector<64x128xf32> to vector<8x128xf32>
    %cst_37 = arith.constant dense<0.000000e+00> : vector<8x128xf32>
    %150 = tpu.matmul %142, %3, %cst_37 {dimension_numbers = #tpu.dot_dimension_numbers<[1], [0], [0], [1], [0, 0, 1, 1], [], []>} : vector<8x32xf32>, vector<32x128xf32>, vector<8x128xf32> -> vector<8x128xf32>
    %151 = arith.addf %149, %150 : vector<8x128xf32>
    %cst_38 = arith.constant 5.000000e-01 : f32
    %152 = vector.broadcast %cst_38 : f32 to vector<8x128xf32>
    %153 = arith.mulf %152, %151 : vector<8x128xf32>
    %154 = math.tanh %153 : vector<8x128xf32>
    %cst_39 = arith.constant 1.000000e+00 : f32
    %155 = vector.broadcast %cst_39 : f32 to vector<8x128xf32>
    %156 = arith.addf %154, %155 : vector<8x128xf32>
    %cst_40 = arith.constant 5.000000e-01 : f32
    %157 = vector.broadcast %cst_40 : f32 to vector<8x128xf32>
    %158 = arith.mulf %157, %156 : vector<8x128xf32>
    %159 = math.tanh %151 : vector<8x128xf32>
    %160 = vector.extract_strided_slice %158 {offsets = [0, 0], sizes = [8, 32], strides = [1, 1]} : vector<8x128xf32> to vector<8x32xf32>
    %161 = vector.extract_strided_slice %158 {offsets = [0, 32], sizes = [8, 32], strides = [1, 1]} : vector<8x128xf32> to vector<8x32xf32>
    %162 = vector.extract_strided_slice %159 {offsets = [0, 64], sizes = [8, 32], strides = [1, 1]} : vector<8x128xf32> to vector<8x32xf32>
    %163 = vector.extract_strided_slice %158 {offsets = [0, 96], sizes = [8, 32], strides = [1, 1]} : vector<8x128xf32> to vector<8x32xf32>
    %164 = arith.mulf %161, %140 : vector<8x32xf32>
    %165 = arith.mulf %160, %162 : vector<8x32xf32>
    %166 = arith.addf %164, %165 : vector<8x32xf32>
    %167 = math.tanh %166 : vector<8x32xf32>
    %168 = arith.mulf %163, %167 : vector<8x32xf32>
    %169 = vector.broadcast %5 : vector<1x32xf32> to vector<8x32xf32>
    %170 = arith.mulf %168, %169 : vector<8x32xf32>
    %cst_41 = arith.constant dense<0.000000e+00> : vector<8xf32>
    %171 = vector.multi_reduction <add>, %170, %cst_41 [1] : vector<8x32xf32> to vector<8xf32>
    %172 = vector.shape_cast %171 : vector<8xf32> to vector<8x1xf32>
    %173 = vector.broadcast %6 : vector<1x1xf32> to vector<8x1xf32>
    %174 = arith.addf %172, %173 : vector<8x1xf32>
    %175 = vector.extract_strided_slice %18 {offsets = [48, 0], sizes = [8, 128], strides = [1, 1]} : vector<64x128xf32> to vector<8x128xf32>
    %cst_42 = arith.constant dense<0.000000e+00> : vector<8x128xf32>
    %176 = tpu.matmul %168, %3, %cst_42 {dimension_numbers = #tpu.dot_dimension_numbers<[1], [0], [0], [1], [0, 0, 1, 1], [], []>} : vector<8x32xf32>, vector<32x128xf32>, vector<8x128xf32> -> vector<8x128xf32>
    %177 = arith.addf %175, %176 : vector<8x128xf32>
    %cst_43 = arith.constant 5.000000e-01 : f32
    %178 = vector.broadcast %cst_43 : f32 to vector<8x128xf32>
    %179 = arith.mulf %178, %177 : vector<8x128xf32>
    %180 = math.tanh %179 : vector<8x128xf32>
    %cst_44 = arith.constant 1.000000e+00 : f32
    %181 = vector.broadcast %cst_44 : f32 to vector<8x128xf32>
    %182 = arith.addf %180, %181 : vector<8x128xf32>
    %cst_45 = arith.constant 5.000000e-01 : f32
    %183 = vector.broadcast %cst_45 : f32 to vector<8x128xf32>
    %184 = arith.mulf %183, %182 : vector<8x128xf32>
    %185 = math.tanh %177 : vector<8x128xf32>
    %186 = vector.extract_strided_slice %184 {offsets = [0, 0], sizes = [8, 32], strides = [1, 1]} : vector<8x128xf32> to vector<8x32xf32>
    %187 = vector.extract_strided_slice %184 {offsets = [0, 32], sizes = [8, 32], strides = [1, 1]} : vector<8x128xf32> to vector<8x32xf32>
    %188 = vector.extract_strided_slice %185 {offsets = [0, 64], sizes = [8, 32], strides = [1, 1]} : vector<8x128xf32> to vector<8x32xf32>
    %189 = vector.extract_strided_slice %184 {offsets = [0, 96], sizes = [8, 32], strides = [1, 1]} : vector<8x128xf32> to vector<8x32xf32>
    %190 = arith.mulf %187, %166 : vector<8x32xf32>
    %191 = arith.mulf %186, %188 : vector<8x32xf32>
    %192 = arith.addf %190, %191 : vector<8x32xf32>
    %193 = math.tanh %192 : vector<8x32xf32>
    %194 = arith.mulf %189, %193 : vector<8x32xf32>
    %195 = vector.broadcast %5 : vector<1x32xf32> to vector<8x32xf32>
    %196 = arith.mulf %194, %195 : vector<8x32xf32>
    %cst_46 = arith.constant dense<0.000000e+00> : vector<8xf32>
    %197 = vector.multi_reduction <add>, %196, %cst_46 [1] : vector<8x32xf32> to vector<8xf32>
    %198 = vector.shape_cast %197 : vector<8xf32> to vector<8x1xf32>
    %199 = vector.broadcast %6 : vector<1x1xf32> to vector<8x1xf32>
    %200 = arith.addf %198, %199 : vector<8x1xf32>
    %201 = vector.extract_strided_slice %18 {offsets = [56, 0], sizes = [8, 128], strides = [1, 1]} : vector<64x128xf32> to vector<8x128xf32>
    %cst_47 = arith.constant dense<0.000000e+00> : vector<8x128xf32>
    %202 = tpu.matmul %194, %3, %cst_47 {dimension_numbers = #tpu.dot_dimension_numbers<[1], [0], [0], [1], [0, 0, 1, 1], [], []>} : vector<8x32xf32>, vector<32x128xf32>, vector<8x128xf32> -> vector<8x128xf32>
    %203 = arith.addf %201, %202 : vector<8x128xf32>
    %cst_48 = arith.constant 5.000000e-01 : f32
    %204 = vector.broadcast %cst_48 : f32 to vector<8x128xf32>
    %205 = arith.mulf %204, %203 : vector<8x128xf32>
    %206 = math.tanh %205 : vector<8x128xf32>
    %cst_49 = arith.constant 1.000000e+00 : f32
    %207 = vector.broadcast %cst_49 : f32 to vector<8x128xf32>
    %208 = arith.addf %206, %207 : vector<8x128xf32>
    %cst_50 = arith.constant 5.000000e-01 : f32
    %209 = vector.broadcast %cst_50 : f32 to vector<8x128xf32>
    %210 = arith.mulf %209, %208 : vector<8x128xf32>
    %211 = math.tanh %203 : vector<8x128xf32>
    %212 = vector.extract_strided_slice %210 {offsets = [0, 0], sizes = [8, 32], strides = [1, 1]} : vector<8x128xf32> to vector<8x32xf32>
    %213 = vector.extract_strided_slice %210 {offsets = [0, 32], sizes = [8, 32], strides = [1, 1]} : vector<8x128xf32> to vector<8x32xf32>
    %214 = vector.extract_strided_slice %211 {offsets = [0, 64], sizes = [8, 32], strides = [1, 1]} : vector<8x128xf32> to vector<8x32xf32>
    %215 = vector.extract_strided_slice %210 {offsets = [0, 96], sizes = [8, 32], strides = [1, 1]} : vector<8x128xf32> to vector<8x32xf32>
    %216 = arith.mulf %213, %192 : vector<8x32xf32>
    %217 = arith.mulf %212, %214 : vector<8x32xf32>
    %218 = arith.addf %216, %217 : vector<8x32xf32>
    %219 = math.tanh %218 : vector<8x32xf32>
    %220 = arith.mulf %215, %219 : vector<8x32xf32>
    %221 = vector.broadcast %5 : vector<1x32xf32> to vector<8x32xf32>
    %222 = arith.mulf %220, %221 : vector<8x32xf32>
    %cst_51 = arith.constant dense<0.000000e+00> : vector<8xf32>
    %223 = vector.multi_reduction <add>, %222, %cst_51 [1] : vector<8x32xf32> to vector<8xf32>
    %224 = vector.shape_cast %223 : vector<8xf32> to vector<8x1xf32>
    %225 = vector.broadcast %6 : vector<1x1xf32> to vector<8x1xf32>
    %226 = arith.addf %224, %225 : vector<8x1xf32>
    %227 = tpu.concatenate %44, %70, %96, %122, %148, %174, %200, %226 in 1 : vector<8x1xf32>, vector<8x1xf32>, vector<8x1xf32>, vector<8x1xf32>, vector<8x1xf32>, vector<8x1xf32>, vector<8x1xf32>, vector<8x1xf32> -> vector<8x8xf32>
    %cst_52 = arith.constant 0.000000e+00 : f32
    %228 = vector.broadcast %cst_52 : f32 to vector<8x56xf32>
    %229 = tpu.concatenate %220, %218, %227, %228 in 1 : vector<8x32xf32>, vector<8x32xf32>, vector<8x8xf32>, vector<8x56xf32> -> vector<8x128xf32>
    %c0_53 = arith.constant 0 : index
    %c0_54 = arith.constant 0 : index
    %230 = vector.load %arg2[%c0_53, %c0_54] : memref<8x128xf32, #tpu.memory_space<vmem>>, vector<8x128xf32>
    tpu.vector_store %arg2[%c0_53, %c0_54], %229 {strides = array<i32>} : memref<8x128xf32, #tpu.memory_space<vmem>>, vector<8x128xf32>,
    return
  }
}

</mosaic_0001>

<bundles_post_ra>
// kernel: critic_forward.1
= control target key start
LH: loop header
LB: loop body
LE: loop exit
PB: predicated region body
PF: predicated region fallthrough
CT: control target
= control target key end

     0   :  { %7 = vsyncpa [#allocation3], 0  ;;  %s1587_s9 = smov [#allocation2]   ;;  %s1866_s0 = inlined_call_operand.vmem [shape: f32[72,128], index: 0, kind: input, shape index: {}]   ;;  %s1867_s1 = inlined_call_operand.hbm [shape: f32[312,128], index: 1, kind: input, shape index: {}]   ;;  %s1868_s2 = inlined_call_operand.vmem [shape: f32[8,128], index: 2, kind: output, shape index: {}]  }
   0x1   :  { %s15_s10 = sshll.u32 %s1587_s9, 4  ;;  %s16_s10 = int_to_ptr.vmem [resolvable:$true] %s15_s10 }
   0x2   :  { %s1573_s11 = scalar_lea.vmem %s16_s10, 4992  ;;  %p1578_p1 = scmp.lt.s32.totalorder %s16_s10, %s16_s10 }
   0x3   :  { %p1574_p0 = scmp.ne.s32.totalorder %s16_s10, %s1573_s11  ;;  %p1579_p2 = scmp.lt.s32.totalorder %s1573_s11, %s1573_s11 }
   0x5   :  { %p1580_p3 = por %p1579_p2, %p1578_p1 }
   0x7   :  { %p1581_p4 = pnand %p1580_p3, %p1574_p0 }
   0x9   :  { %1584 = shalt.err (!%p1581_p4)
}
   0xa   :  { %s1588_s12 = smov 128   ;;  %s1589_s13 = smov 8  }
   0xb   :  { %21 = dma.hbm_to_vmem [thread:$0]  %s1867_s1, 4992, %s16_s10, [#allocation3], %s1588_s12, %s1588_s12, %s1589_s13  }
   0xc   :  { %1585 = dma.done.wait [#allocation3], 4992  }
   0xd   :  { %1586 = vsyncadd [#allocation3], 4294962304  ;;  %v40_v0 = vld [vmem:[#allocation2 + $0x78] sm:$0xff]  ;;  %v39_v1 = vld [vmem:[#allocation2 + $0x70] sm:$0xff]  ;;  %v1590_v32 = vmov 0.0   ;;  %vm299_vm0 = vcmask 261120  }
   0xe   :  { %1326 = vmatprep.subr.mxu0 %v40_v0  ;;  %v38_v2 = vld [vmem:[#allocation2 + $0x68] sm:$0xff]  ;;  %v37_v3 = vld [vmem:[#allocation2 + $0x60] sm:$0xff]  ;;  %v36_v5 = vld [vmem:[#allocation2 + $0x58] sm:$0xff]  ;;  %vm1591_vm1 = vmmov 0   ;;  %s1593_s5 = smov 32   ;;  %s1594_s6 = smov 96  }
   0xf   :  { %1327 = vmatpush3.msra.mxu0 %v40_v0  ;;  %v64_v4 = vld [vmem:[%s1866_s0] sm:$0xff]  ;;  %v56_v7 = vld [vmem:[#allocation2 + $0xf8] sm:$0xff]  ;;  %v35_v8 = vld [vmem:[#allocation2 + $0x50] sm:$0xff]  ;;  %s1595_s7 = smov 98   ;;  %s1596_s8 = smov 99   ;;  %vm1194_vm2 = vcmask 7168  }
  0x10   :  { %1328 = vmatprep.subr.mxu0 %v39_v1  ;;  %1358 = vmatprep.mubr.f32.mxu0 %v64_v4  ;;  %v57_v6 = vld [vmem:[#allocation2 + $0x100] sm:$0xff]  ;;  %v55_v9 = vld [vmem:[#allocation2 + $0xf0] sm:$0xff]  ;;  %v34_v10 = vld [vmem:[#allocation2 + $0x48] sm:$0xff]  ;;  %s1597_s9 = smov 101   ;;  %s1598_s10 = smov 97   ;;  %vm1196_vm3 = vcmask 15360  }
  0x11   :  { %1329 = vmatpush3.msra.mxu0 %v39_v1  ;;  %1370 = vmatprep.subr.mxu1 %v57_v6  ;;  %v54_v11 = vld [vmem:[#allocation2 + $0xe8] sm:$0xff]  ;;  %v33_v12 = vld [vmem:[#allocation2 + $0x40] sm:$0xff]  ;;  %v32_v14 = vld [vmem:[#allocation2 + $0x38] sm:$0xff]  ;;  %s1599_s11 = smov 100   ;;  %s1600_s12 = smov 102   ;;  %vm1198_vm4 = vcmask 23552  }
  0x12   :  { %1330 = vmatprep.subr.mxu0 %v38_v2  ;;  %1371 = vmatpush3.msra.mxu1 %v57_v6  ;;  %v53_v13 = vld [vmem:[#allocation2 + $0xe0] sm:$0xff]  ;;  %v52_v15 = vld [vmem:[#allocation2 + $0xd8] sm:$0xff]  ;;  %v31_v16 = vld [vmem:[#allocation2 + $0x30] sm:$0xff]  ;;  %s1601_s13 = smov 103   ;;  %vm1200_vm5 = vcmask 31744   ;;  %vm1202_vm6 = vcmask 39936  }
  0x13   :  { %1331 = vmatpush3.msra.mxu0 %v38_v2  ;;  %1372 = vmatprep.subr.mxu1 %v56_v7  ;;  %v51_v17 = vld [vmem:[#allocation2 + $0xd0] sm:$0xff]  ;;  %v30_v18 = vld [vmem:[#allocation2 + $0x28] sm:$0xff]  ;;  %v29_v20 = vld [vmem:[#allocation2 + $0x20] sm:$0xff]  ;;  %vm1204_vm7 = vcmask 48128   ;;  %vm1206_vm8 = vcmask 56320   ;;  %vm1217_vm9 = vcmask 523264  }
  0x14   :  { %1332 = vmatprep.subr.mxu0 %v37_v3  ;;  %1373 = vmatpush3.msra.mxu1 %v56_v7  ;;  %v50_v19 = vld [vmem:[#allocation2 + $0xc8] sm:$0xff]  ;;  %v49_v21 = vld [vmem:[#allocation2 + $0xc0] sm:$0xff]  ;;  %v28_v22 = vld [vmem:[#allocation2 + $0x18] sm:$0xff]  ;;  %vm1219_vm10 = vcmask 588800  }
  0x15   :  { %1333 = vmatpush3.msra.mxu0 %v37_v3  ;;  %1374 = vmatprep.subr.mxu1 %v55_v9  ;;  %v48_v23 = vld [vmem:[#allocation2 + $0xb8] sm:$0xff]  ;;  %v27_v24 = vld [vmem:[#allocation2 + $0x10] sm:$0xff]  ;;  %v26_v26 = vld [vmem:[#allocation2 + $0x8] sm:$0xff] }
  0x16   :  { %1334 = vmatprep.subr.mxu0 %v36_v5  ;;  %1375 = vmatpush3.msra.mxu1 %v55_v9  ;;  %v47_v25 = vld [vmem:[#allocation2 + $0xb0] sm:$0xff]  ;;  %v46_v27 = vld [vmem:[#allocation2 + $0xa8] sm:$0xff]  ;;  %v25_v28 = vld [vmem:[#allocation2] sm:$0xff] }
  0x17   :  { %1335 = vmatpush3.msra.mxu0 %v36_v5  ;;  %1376 = vmatprep.subr.mxu1 %v54_v11  ;;  %v65_v29 = vld [vmem:[%s1866_s0 + $0x8] sm:$0xff]  ;;  %v66_v30 = vld [vmem:[%s1866_s0 + $0x10] sm:$0xff]  ;;  %v1629_v31 = vld [vmem:[#allocation2 + $0x120] sm:$0xff] }
  0x18   :  { %1336 = vmatprep.subr.mxu0 %v35_v8  ;;  %1377 = vmatpush3.msra.mxu1 %v54_v11  ;;  %v67_v33 = vld [vmem:[%s1866_s0 + $0x18] sm:$0xff]  ;;  %v68_v34 = vld [vmem:[%s1866_s0 + $0x20] sm:$0xff]  ;;  %v69_v35 = vld [vmem:[%s1866_s0 + $0x28] sm:$0xff] }
  0x19   :  { %1337 = vmatpush3.msra.mxu0 %v35_v8  ;;  %1378 = vmatprep.subr.mxu1 %v53_v13  ;;  %v45_v36 = vld [vmem:[#allocation2 + $0xa0] sm:$0xff]  ;;  %v70_v37 = vld [vmem:[%s1866_s0 + $0x30] sm:$0xff]  ;;  %v44_v38 = vld [vmem:[#allocation2 + $0x98] sm:$0xff] }
  0x1a   :  { %1338 = vmatprep.subr.mxu0 %v34_v10  ;;  %1379 = vmatpush3.msra.mxu1 %v53_v13  ;;  %v71_v39 = vld [vmem:[%s1866_s0 + $0x38] sm:$0xff]  ;;  %v43_v41 = vld [vmem:[#allocation2 + $0x90] sm:$0xff]  ;;  %v42_v43 = vld [vmem:[#allocation2 + $0x88] sm:$0xff] }
  0x1b   :  { %1339 = vmatpush3.msra.mxu0 %v34_v10  ;;  %1380 = vmatprep.subr.mxu1 %v52_v15  ;;  %v1649_v40 = vld [vmem:[#allocation2 + $0x118] sm:$0xff]  ;;  %v1651_v42 = vld [vmem:[#allocation2 + $0x110] sm:$0xff]  ;;  %v1657_v44 = vld [vmem:[#allocation2 + $0x108] sm:$0xff] }
  0x1c   :  { %1340 = vmatprep.subr.mxu0 %v33_v12  ;;  %1381 = vmatpush3.msra.mxu1 %v52_v15  ;;  %v1662_v45 = vld [vmem:[%s1866_s0 + $0x40] sm:$0xff]  ;;  %v1691_v10 = vld [vmem:[#allocation2 + $0x128] ss:$0 sm:$0xff]  ;;  %s1592_s0 = smov 64  }
  0x1d   :  { %1341 = vmatpush3.msra.mxu0 %v33_v12  ;;  %1382 = vmatprep.subr.mxu1 %v51_v17  ;;  %v1227_v46 = vld [vmem:[#allocation2 + $0x80] ss:$0 sm:$0xff] }
  0x1e   :  { %1342 = vmatprep.subr.mxu0 %v32_v14  ;;  %1383 = vmatpush3.msra.mxu1 %v51_v17 }
  0x1f   :  { %1343 = vmatpush3.msra.mxu0 %v32_v14  ;;  %1384 = vmatprep.subr.mxu1 %v50_v19 }
  0x20   :  { %1344 = vmatprep.subr.mxu0 %v31_v16  ;;  %1385 = vmatpush3.msra.mxu1 %v50_v19 }
  0x21   :  { %1345 = vmatpush3.msra.mxu0 %v31_v16  ;;  %1386 = vmatprep.subr.mxu1 %v49_v21 }
  0x22   :  { %1346 = vmatprep.subr.mxu0 %v30_v18  ;;  %1387 = vmatpush3.msra.mxu1 %v49_v21 }
  0x23   :  { %1347 = vmatpush3.msra.mxu0 %v30_v18  ;;  %1388 = vmatprep.subr.mxu1 %v48_v23 }
  0x24   :  { %1348 = vmatprep.subr.mxu0 %v29_v20  ;;  %1389 = vmatpush3.msra.mxu1 %v48_v23 }
  0x25   :  { %1349 = vmatpush3.msra.mxu0 %v29_v20  ;;  %1390 = vmatprep.subr.mxu1 %v47_v25 }
  0x26   :  { %1350 = vmatprep.subr.mxu0 %v28_v22  ;;  %1391 = vmatpush3.msra.mxu1 %v47_v25 }
  0x27   :  { %1351 = vmatpush3.msra.mxu0 %v28_v22  ;;  %1392 = vmatprep.subr.mxu1 %v46_v27 }
  0x28   :  { %1352 = vmatprep.subr.mxu0 %v27_v24  ;;  %1393 = vmatpush3.msra.mxu1 %v46_v27 }
  0x29   :  { %1353 = vmatpush3.msra.mxu0 %v27_v24  ;;  %1394 = vmatprep.subr.mxu1 %v45_v36 }
  0x2a   :  { %1354 = vmatprep.subr.mxu0 %v26_v26  ;;  %1395 = vmatpush3.msra.mxu1 %v45_v36 }
  0x2b   :  { %1355 = vmatpush3.msra.mxu0 %v26_v26  ;;  %1396 = vmatprep.subr.mxu1 %v44_v38 }
  0x2c   :  { %1356 = vmatprep.subr.mxu0 %v25_v28  ;;  %1397 = vmatpush3.msra.mxu1 %v44_v38 }
  0x2d   :  { %1357 = vmatpush3.msra.mxu0 %v25_v28  ;;  %1398 = vmatprep.subr.mxu1 %v43_v41 }
  0x2e   :  { %1359 = vmatmul.mubr.f32.vlgmr.msra.gmra.mxu0 %v65_v29  ;;  %1414 = vmatprep.subr.mxu0 %v1590_v32 }
  0x2f   :  { %1361 = vmatprep.mubr.f32.mxu0 %v66_v30  ;;  %1415 = vmatpush3.msra.mxu0 %v1629_v31 }
  0x30   :  { %1416 = vmatprep.subr.mxu0 %v1590_v32  ;;  %1399 = vmatpush3.msra.mxu1 %v43_v41 }
  0x31   :  { %1417 = vmatpush3.msra.mxu0 %v1649_v40  ;;  %1400 = vmatprep.subr.mxu1 %v42_v43 }
  0x32   :  { %1362 = vmatmul.mubr.f32.gmra.mxu0 %v67_v33  ;;  %1418 = vmatprep.subr.mxu0 %v1590_v32 }
  0x33   :  { %1364 = vmatprep.mubr.f32.mxu0 %v68_v34  ;;  %1419 = vmatpush3.msra.mxu0 %v1651_v42 }
  0x34   :  { %1401 = vmatpush3.msra.mxu1 %v42_v43  ;;  %1420 = vmatprep.subr.mxu0 %v1590_v32 }
  0x35   :  { %1425 = vmatprep.subr.mxu1 %v1590_v32  ;;  %1421 = vmatpush3.msra.mxu0 %v1657_v44 }
  0x36   :  { %1365 = vmatmul.mubr.f32.gmra.mxu0 %v69_v35  ;;  %1436 = vmatprep.subr.mxu0 %v1590_v32 }
  0x37   :  { %1367 = vmatprep.mubr.f32.mxu0 %v70_v37 }
  0x3a   :  { %1368 = vmatmul.mubr.f32.gmra.mxu0 %v71_v39 }
  0x3b   :  { %1422 = vmatprep.mubr.msk.f32.mxu0 %vm1591_vm1, %v1590_v32 }
  0x3e   :  { %1423 = vmatmul.mubr.msk.f32.vlgmr.msra.gmra.mxu0 %vm299_vm0, %v1662_v45 }
  0x3f   :  { %1437 = vmatpush3.msra.mxu0 %v1629_v31  ;;  %1444 = vmatprep.mubr.msk.f32.mxu0 %vm1591_vm1, %v1590_v32 }
  0x40   :  { %1438 = vmatprep.subr.mxu0 %v1590_v32 }
  0x41   :  { %1439 = vmatpush3.msra.mxu0 %v1649_v40 }
  0x42   :  { %1440 = vmatprep.subr.mxu0 %v1590_v32 }
  0x43   :  { %1441 = vmatpush3.msra.mxu0 %v1651_v42 }
  0x44   :  { %1442 = vmatprep.subr.mxu0 %v1590_v32 }
  0x45   :  { %1443 = vmatpush3.msra.mxu0 %v1657_v44 }
  0x46   :  { %1458 = vmatprep.subr.mxu0 %v1590_v32 }
  0xee   :  { %v1360_v47 = vpop.f32.mrf.mxu0 }
  0xef   :  { %v149_v48 = vadd.f32 %v1360_v47, %v1227_v46 }
  0xf0   :  { %v143_v49 = vpop.f32.mrf.mxu0 }
  0xf1   :  { %v144_v50 = vadd.f32 %v1227_v46, %v143_v49  ;;  %v183_v54 = vmax.f32 %v149_v48, 0.0 }
  0xf2   :  { %v1363_v51 = vpop.f32.mrf.mxu0 }
  0xf3   :  { %v182_v52 = vmax.f32 %v144_v50, 0.0  ;;  %v159_v53 = vadd.f32 %v1363_v51, %v1227_v46 }
  0xf4   :  { %v153_v55 = vpop.f32.mrf.mxu0 }
  0xf5   :  { %1402 = vmatprep.mubr.f32.mxu1 %v182_v52  ;;  %v154_v56 = vadd.f32 %v1227_v46, %v153_v55  ;;  %v185_v57 = vmax.f32 %v159_v53, 0.0 }
  0xf6   :  { %1403 = vmatmul.mubr.f32.vlgmr.msra.gmra.mxu1 %v183_v54  ;;  %v1366_v58 = vpop.f32.mrf.mxu0 }
  0xf7   :  { %v184_v59 = vmax.f32 %v154_v56, 0.0  ;;  %v169_v60 = vadd.f32 %v1366_v58, %v1227_v46  ;;  %1426 = vmatpush3.msra.mxu1 %v1629_v31 }
  0xf8   :  { %v163_v61 = vpop.f32.mrf.mxu0  ;;  %1427 = vmatprep.subr.mxu1 %v1590_v32 }
  0xf9   :  { %v164_v62 = vadd.f32 %v1227_v46, %v163_v61  ;;  %1405 = vmatprep.mubr.f32.mxu1 %v184_v59  ;;  %1428 = vmatpush3.msra.mxu1 %v1649_v40  ;;  %v187_v63 = vmax.f32 %v169_v60, 0.0 }
  0xfa   :  { %1406 = vmatmul.mubr.f32.gmra.mxu1 %v185_v57  ;;  %1429 = vmatprep.subr.mxu1 %v1590_v32  ;;  %v1369_v1 = vpop.f32.mrf.mxu0 }
  0xfb   :  { %v186_v0 = vmax.f32 %v164_v62, 0.0  ;;  %1430 = vmatpush3.msra.mxu1 %v1651_v42  ;;  %v179_v2 = vadd.f32 %v1369_v1, %v1227_v46 }
  0xfc   :  { %1431 = vmatprep.subr.mxu1 %v1590_v32  ;;  %v173_v3 = vpop.f32.mrf.mxu0 }
  0xfd   :  { %1408 = vmatprep.mubr.f32.mxu1 %v186_v0  ;;  %1432 = vmatpush3.msra.mxu1 %v1657_v44  ;;  %v174_v4 = vadd.f32 %v1227_v46, %v173_v3  ;;  %v189_v5 = vmax.f32 %v179_v2, 0.0 }
  0xfe   :  { %1409 = vmatmul.mubr.f32.gmra.mxu1 %v187_v63  ;;  %1447 = vmatprep.subr.mxu1 %v1590_v32  ;;  %v369_v7 = vpop.f32.mrf.mxu0 }
  0xff   :  { %v188_v6 = vmax.f32 %v174_v4, 0.0 }
 0x100   :  { %v1424_v8 = vpop.f32.mrf.mxu0 }
 0x101   :  { %1411 = vmatprep.mubr.f32.mxu1 %v188_v6 }
 0x102   :  { %1412 = vmatmul.mubr.f32.gmra.mxu1 %v189_v5 }
 0x103   :  { %1433 = vmatprep.mubr.msk.f32.mxu1 %vm1591_vm1, %v1590_v32 }
 0x1b6   :  { %v1404_v9 = vpop.f32.mrf.mxu1 }
 0x1b7   :  { %v266_v36 = vadd.f32 %v1404_v9, %v1691_v10 }
 0x1b8   :  { %v260_v11 = vpop.f32.mrf.mxu1 }
 0x1b9   :  { %v261_v12 = vadd.f32 %v1691_v10, %v260_v11 }
 0x1ba   :  { %v1713_v28 = vpop.f32.mrf.mxu1 }
 0x1bb   :  { %v373_v13 = vadd.f32 %v369_v7, %v261_v12  ;;  %v276_v12 = vadd.f32 %v1713_v28, %v1691_v10 }
 0x1bc   :  { %v270_v29 = vpop.f32.mrf.mxu1 }
 0x1bd   :  { %1517 = vtanh.f32 %v373_v13  ;;  %v374_v15 = vmul.f32 0.5, %v373_v13  ;;  %v271_v57 = vadd.f32 %v1691_v10, %v270_v29 }
 0x1be   :  { %v1715_v30 = vpop.f32.mrf.mxu1 }
 0x1bf   :  { %1519 = vtanh.f32 %v374_v15 }
 0x1c0   :  { %v1717_v33 = vpop.f32.mrf.mxu1 }
 0x1c2   :  { %v1719_v34 = vpop.f32.mrf.mxu1 }
 0x1c4   :  { %v1721_v35 = vpop.f32.mrf.mxu1 }
 0x1ca   :  { %v1518_v14 = vpop.eup %1517 }
 0x1cb   :  { %381 = vrot.lane.b32.xlu0 %v1518_v14, %s1592_s0 }
 0x1cc   :  { %v1520_v16 = vpop.eup %1519 }
 0x1cd   :  { %v376_v17 = vadd.f32 1.0, %v1520_v16 }
 0x1cf   :  { %v377_v18 = vmul.f32 0.5, %v376_v17 }
 0x1d1   :  { %v379_v21 = vmul.f32 %v377_v18, %v1662_v45 }
 0x23d   :  { %v382_v19 = vpop.permute.xlu0 %381 }
 0x23e   :  { %v384_v20 = vmul.f32 %v382_v19, %v377_v18 }
 0x240   :  { %386 = vrot.lane.b32.xlu0 %v384_v20, %s1593_s5 }
 0x2b2   :  { %v387_v22 = vpop.permute.xlu0 %386 }
 0x2b3   :  { %v389_v23 = vadd.f32 %v387_v22, %v379_v21 }
 0x2b5   :  { %1521 = vtanh.f32 %v389_v23 }
 0x2c2   :  { %v1522_v24 = vpop.eup %1521 }
 0x2c3   :  { %392 = vrot.lane.b32.xlu1 %v1522_v24, %s1592_s0 }
 0x335   :  { %v393_v25 = vpop.permute.xlu1 %392 }
 0x336   :  { %v1698_v26 = vmul.f32 %v393_v25, %v377_v18 }
 0x338   :  { %414 = vrot.lane.b32.xlu1 %v1698_v26, %s1593_s5 }
 0x3aa   :  { %v415_v27 = vpop.permute.xlu1 %414 }
 0x3ab   :  { %1434 = vmatmul.mubr.msk.f32.vlgmr.msra.gmra.mxu1 %vm299_vm0, %v415_v27 }
 0x3ac   :  { %1448 = vmatpush3.msra.mxu1 %v1629_v31  ;;  %1455 = vmatprep.mubr.msk.f32.mxu1 %vm1591_vm1, %v1590_v32 }
 0x3ad   :  { %1449 = vmatprep.subr.mxu1 %v1590_v32 }
 0x3ae   :  { %1450 = vmatpush3.msra.mxu1 %v1649_v40 }
 0x3af   :  { %1451 = vmatprep.subr.mxu1 %v1590_v32 }
 0x3b0   :  { %1452 = vmatpush3.msra.mxu1 %v1651_v42 }
 0x3b1   :  { %1453 = vmatprep.subr.mxu1 %v1590_v32 }
 0x3b2   :  { %1454 = vmatpush3.msra.mxu1 %v1657_v44 }
 0x3b3   :  { %1469 = vmatprep.subr.mxu1 %v1590_v32 }
 0x46b   :  { %v484_v37 = vpop.f32.mrf.mxu1 }
 0x46c   :  { %v488_v38 = vadd.f32 %v484_v37, %v266_v36  ;;  %v281_v37 = vadd.f32 %v1691_v10, %v1717_v33 }
 0x46d   :  { %v1435_v39 = vpop.f32.mrf.mxu1 }
 0x46e   :  { %1523 = vtanh.f32 %v488_v38  ;;  %v489_v43 = vmul.f32 0.5, %v488_v38 }
 0x470   :  { %1525 = vtanh.f32 %v489_v43 }
 0x47b   :  { %v1524_v41 = vpop.eup %1523 }
 0x47c   :  { %496 = vrot.lane.b32.xlu0 %v1524_v41, %s1592_s0 }
 0x47d   :  { %v1526_v45 = vpop.eup %1525 }
 0x47e   :  { %v491_v46 = vadd.f32 1.0, %v1526_v45 }
 0x480   :  { %v492_v47 = vmul.f32 0.5, %v491_v46 }
 0x482   :  { %v494_v50 = vmul.f32 %v492_v47, %v389_v23 }
 0x4ee   :  { %v497_v48 = vpop.permute.xlu0 %496 }
 0x4ef   :  { %v499_v49 = vmul.f32 %v497_v48, %v492_v47 }
 0x4f1   :  { %501 = vrot.lane.b32.xlu1 %v499_v49, %s1593_s5 }
 0x563   :  { %v502_v51 = vpop.permute.xlu1 %501 }
 0x564   :  { %v504_v52 = vadd.f32 %v502_v51, %v494_v50 }
 0x566   :  { %1527 = vtanh.f32 %v504_v52 }
 0x573   :  { %v1528_v53 = vpop.eup %1527 }
 0x574   :  { %507 = vrot.lane.b32.xlu0 %v1528_v53, %s1592_s0 }
 0x5e6   :  { %v508_v54 = vpop.permute.xlu0 %507 }
 0x5e7   :  { %v1727_v55 = vmul.f32 %v508_v54, %v492_v47 }
 0x5e9   :  { %521 = vrot.lane.b32.xlu1 %v1727_v55, %s1593_s5 }
 0x65b   :  { %v522_v56 = vpop.permute.xlu1 %521 }
 0x65c   :  { %1445 = vmatmul.mubr.msk.f32.vlgmr.msra.gmra.mxu0 %vm299_vm0, %v522_v56 }
 0x65d   :  { %1459 = vmatpush3.msra.mxu0 %v1629_v31  ;;  %1466 = vmatprep.mubr.msk.f32.mxu0 %vm1591_vm1, %v1590_v32 }
 0x65e   :  { %1460 = vmatprep.subr.mxu0 %v1590_v32 }
 0x65f   :  { %1461 = vmatpush3.msra.mxu0 %v1649_v40 }
 0x660   :  { %1462 = vmatprep.subr.mxu0 %v1590_v32 }
 0x661   :  { %1463 = vmatpush3.msra.mxu0 %v1651_v42 }
 0x662   :  { %1464 = vmatprep.subr.mxu0 %v1590_v32 }
 0x663   :  { %1465 = vmatpush3.msra.mxu0 %v1657_v44 }
 0x664   :  { %1480 = vmatprep.subr.mxu0 %v1590_v32 }
 0x71c   :  { %v591_v58 = vpop.f32.mrf.mxu0 }
 0x71d   :  { %v595_v59 = vadd.f32 %v591_v58, %v271_v57  ;;  %v286_v58 = vadd.f32 %v1715_v30, %v1691_v10 }
 0x71e   :  { %v1446_v60 = vpop.f32.mrf.mxu0 }
 0x71f   :  { %1529 = vtanh.f32 %v595_v59  ;;  %v596_v62 = vmul.f32 0.5, %v595_v59 }
 0x721   :  { %1531 = vtanh.f32 %v596_v62 }
 0x72c   :  { %v1530_v61 = vpop.eup %1529 }
 0x72d   :  { %603 = vrot.lane.b32.xlu0 %v1530_v61, %s1592_s0 }
 0x72e   :  { %v1532_v63 = vpop.eup %1531 }
 0x72f   :  { %v598_v0 = vadd.f32 1.0, %v1532_v63 }
 0x731   :  { %v599_v1 = vmul.f32 0.5, %v598_v0 }
 0x733   :  { %v601_v4 = vmul.f32 %v599_v1, %v504_v52 }
 0x79f   :  { %v604_v2 = vpop.permute.xlu0 %603 }
 0x7a0   :  { %v606_v3 = vmul.f32 %v604_v2, %v599_v1 }
 0x7a2   :  { %608 = vrot.lane.b32.xlu1 %v606_v3, %s1593_s5 }
 0x814   :  { %v609_v5 = vpop.permute.xlu1 %608 }
 0x815   :  { %v611_v6 = vadd.f32 %v609_v5, %v601_v4 }
 0x817   :  { %1533 = vtanh.f32 %v611_v6 }
 0x824   :  { %v1534_v7 = vpop.eup %1533 }
 0x825   :  { %614 = vrot.lane.b32.xlu0 %v1534_v7, %s1592_s0 }
 0x897   :  { %v615_v8 = vpop.permute.xlu0 %614 }
 0x898   :  { %v1746_v9 = vmul.f32 %v615_v8, %v599_v1 }
 0x89a   :  { %628 = vrot.lane.b32.xlu1 %v1746_v9, %s1593_s5 }
 0x90c   :  { %v629_v11 = vpop.permute.xlu1 %628 }
 0x90d   :  { %1456 = vmatmul.mubr.msk.f32.vlgmr.msra.gmra.mxu1 %vm299_vm0, %v629_v11 }
 0x90e   :  { %1470 = vmatpush3.msra.mxu1 %v1629_v31  ;;  %1477 = vmatprep.mubr.msk.f32.mxu1 %vm1591_vm1, %v1590_v32 }
 0x90f   :  { %1471 = vmatprep.subr.mxu1 %v1590_v32 }
 0x910   :  { %1472 = vmatpush3.msra.mxu1 %v1649_v40 }
 0x911   :  { %1473 = vmatprep.subr.mxu1 %v1590_v32 }
 0x912   :  { %1474 = vmatpush3.msra.mxu1 %v1651_v42 }
 0x913   :  { %1475 = vmatprep.subr.mxu1 %v1590_v32 }
 0x914   :  { %1476 = vmatpush3.msra.mxu1 %v1657_v44 }
 0x915   :  { %1491 = vmatprep.subr.mxu1 %v1590_v32 }
 0x9cd   :  { %v698_v13 = vpop.f32.mrf.mxu1 }
 0x9ce   :  { %v702_v14 = vadd.f32 %v698_v13, %v276_v12 }
 0x9cf   :  { %v1457_v15 = vpop.f32.mrf.mxu1 }
 0x9d0   :  { %1535 = vtanh.f32 %v702_v14  ;;  %v703_v17 = vmul.f32 0.5, %v702_v14 }
 0x9d2   :  { %1537 = vtanh.f32 %v703_v17 }
 0x9dd   :  { %v1536_v16 = vpop.eup %1535 }
 0x9de   :  { %710 = vrot.lane.b32.xlu0 %v1536_v16, %s1592_s0 }
 0x9df   :  { %v1538_v18 = vpop.eup %1537 }
 0x9e0   :  { %v705_v19 = vadd.f32 1.0, %v1538_v18 }
 0x9e2   :  { %v706_v20 = vmul.f32 0.5, %v705_v19 }
 0x9e4   :  { %v708_v23 = vmul.f32 %v706_v20, %v611_v6  ;;  %v291_v6 = vadd.f32 %v1691_v10, %v1721_v35 }
 0xa50   :  { %v711_v21 = vpop.permute.xlu0 %710 }
 0xa51   :  { %v713_v22 = vmul.f32 %v711_v21, %v706_v20 }
 0xa53   :  { %715 = vrot.lane.b32.xlu1 %v713_v22, %s1593_s5 }
 0xac5   :  { %v716_v24 = vpop.permute.xlu1 %715 }
 0xac6   :  { %v718_v25 = vadd.f32 %v716_v24, %v708_v23 }
 0xac8   :  { %1539 = vtanh.f32 %v718_v25 }
 0xad5   :  { %v1540_v27 = vpop.eup %1539 }
 0xad6   :  { %721 = vrot.lane.b32.xlu0 %v1540_v27, %s1592_s0 }
 0xb48   :  { %v722_v28 = vpop.permute.xlu0 %721 }
 0xb49   :  { %v1766_v29 = vmul.f32 %v722_v28, %v706_v20 }
 0xb4b   :  { %735 = vrot.lane.b32.xlu1 %v1766_v29, %s1593_s5 }
 0xbbd   :  { %v736_v36 = vpop.permute.xlu1 %735 }
 0xbbe   :  { %1467 = vmatmul.mubr.msk.f32.vlgmr.msra.gmra.mxu0 %vm299_vm0, %v736_v36 }
 0xbbf   :  { %1481 = vmatpush3.msra.mxu0 %v1629_v31  ;;  %1488 = vmatprep.mubr.msk.f32.mxu0 %vm1591_vm1, %v1590_v32 }
 0xbc0   :  { %1482 = vmatprep.subr.mxu0 %v1590_v32 }
 0xbc1   :  { %1483 = vmatpush3.msra.mxu0 %v1649_v40 }
 0xbc2   :  { %1484 = vmatprep.subr.mxu0 %v1590_v32 }
 0xbc3   :  { %1485 = vmatpush3.msra.mxu0 %v1651_v42 }
 0xbc4   :  { %1486 = vmatprep.subr.mxu0 %v1590_v32 }
 0xbc5   :  { %1487 = vmatpush3.msra.mxu0 %v1657_v44 }
 0xc7e   :  { %v805_v38 = vpop.f32.mrf.mxu0 }
 0xc7f   :  { %v809_v39 = vadd.f32 %v805_v38, %v281_v37  ;;  %v1819_v38 = vld [vmem:[#allocation2 + $0x130] ss:$0 sm:$0xff] }
 0xc80   :  { %v1468_v41 = vpop.f32.mrf.mxu0 }
 0xc81   :  { %1541 = vtanh.f32 %v809_v39  ;;  %v810_v45 = vmul.f32 0.5, %v809_v39 }
 0xc83   :  { %1543 = vtanh.f32 %v810_v45 }
 0xc8e   :  { %v1542_v43 = vpop.eup %1541 }
 0xc8f   :  { %817 = vrot.lane.b32.xlu0 %v1542_v43, %s1592_s0 }
 0xc90   :  { %v1544_v46 = vpop.eup %1543 }
 0xc91   :  { %v812_v47 = vadd.f32 1.0, %v1544_v46 }
 0xc93   :  { %v813_v48 = vmul.f32 0.5, %v812_v47 }
 0xc95   :  { %v815_v51 = vmul.f32 %v813_v48, %v718_v25  ;;  %v296_v25 = vadd.f32 %v1719_v34, %v1691_v10 }
 0xd01   :  { %v818_v49 = vpop.permute.xlu0 %817 }
 0xd02   :  { %v820_v50 = vmul.f32 %v818_v49, %v813_v48 }
 0xd04   :  { %822 = vrot.lane.b32.xlu1 %v820_v50, %s1593_s5 }
 0xd76   :  { %v823_v52 = vpop.permute.xlu1 %822 }
 0xd77   :  { %v825_v53 = vadd.f32 %v823_v52, %v815_v51 }
 0xd79   :  { %1545 = vtanh.f32 %v825_v53 }
 0xd86   :  { %v1546_v33 = vpop.eup %1545 }
 0xd87   :  { %828 = vrot.lane.b32.xlu0 %v1546_v33, %s1592_s0 }
 0xdf9   :  { %v829_v54 = vpop.permute.xlu0 %828 }
 0xdfa   :  { %v1785_v56 = vmul.f32 %v829_v54, %v813_v48 }
 0xdfc   :  { %842 = vrot.lane.b32.xlu1 %v1785_v56, %s1593_s5 }
 0xe6e   :  { %v843_v57 = vpop.permute.xlu1 %842 }
 0xe6f   :  { %1478 = vmatmul.mubr.msk.f32.vlgmr.msra.gmra.mxu1 %vm299_vm0, %v843_v57 }
 0xe70   :  { %1492 = vmatpush3.msra.mxu1 %v1629_v31  ;;  %1499 = vmatprep.mubr.msk.f32.mxu1 %vm1591_vm1, %v1590_v32 }
 0xe71   :  { %1493 = vmatprep.subr.mxu1 %v1590_v32 }
 0xe72   :  { %1494 = vmatpush3.msra.mxu1 %v1649_v40 }
 0xe73   :  { %1495 = vmatprep.subr.mxu1 %v1590_v32 }
 0xe74   :  { %1496 = vmatpush3.msra.mxu1 %v1651_v42 }
 0xe75   :  { %1497 = vmatprep.subr.mxu1 %v1590_v32 }
 0xe76   :  { %1498 = vmatpush3.msra.mxu1 %v1657_v44 }
 0xf2f   :  { %v912_v59 = vpop.f32.mrf.mxu1 }
 0xf30   :  { %v916_v31 = vadd.f32 %v912_v59, %v286_v58 }
 0xf31   :  { %v1479_v60 = vpop.f32.mrf.mxu1 }
 0xf32   :  { %1547 = vtanh.f32 %v916_v31  ;;  %v917_v62 = vmul.f32 0.5, %v916_v31 }
 0xf34   :  { %1549 = vtanh.f32 %v917_v62 }
 0xf3f   :  { %v1548_v61 = vpop.eup %1547 }
 0xf40   :  { %924 = vrot.lane.b32.xlu0 %v1548_v61, %s1592_s0 }
 0xf41   :  { %v1550_v40 = vpop.eup %1549 }
 0xf42   :  { %v919_v63 = vadd.f32 1.0, %v1550_v40 }
 0xf44   :  { %v920_v0 = vmul.f32 0.5, %v919_v63 }
 0xf46   :  { %v922_v32 = vmul.f32 %v920_v0, %v825_v53 }
 0xfb2   :  { %v925_v42 = vpop.permute.xlu0 %924 }
 0xfb3   :  { %v927_v1 = vmul.f32 %v925_v42, %v920_v0 }
 0xfb5   :  { %929 = vrot.lane.b32.xlu1 %v927_v1, %s1593_s5 }
0x1027   :  { %v930_v44 = vpop.permute.xlu1 %929 }
0x1028   :  { %v932_v2 = vadd.f32 %v930_v44, %v922_v32 }
0x102a   :  { %1551 = vtanh.f32 %v932_v2 }
0x1037   :  { %v1552_v30 = vpop.eup %1551 }
0x1038   :  { %935 = vrot.lane.b32.xlu0 %v1552_v30, %s1592_s0 }
0x10aa   :  { %v936_v3 = vpop.permute.xlu0 %935 }
0x10ab   :  { %v1804_v4 = vmul.f32 %v936_v3, %v920_v0 }
0x10ad   :  { %949 = vrot.lane.b32.xlu1 %v1804_v4, %s1593_s5 }
0x111f   :  { %v950_v5 = vpop.permute.xlu1 %949 }
0x1120   :  { %1489 = vmatmul.mubr.msk.f32.vlgmr.msra.gmra.mxu0 %vm299_vm0, %v950_v5 }
0x11e0   :  { %v1019_v7 = vpop.f32.mrf.mxu0 }
0x11e1   :  { %v1023_v8 = vadd.f32 %v1019_v7, %v291_v6 }
0x11e2   :  { %v1490_v11 = vpop.f32.mrf.mxu0 }
0x11e3   :  { %1553 = vtanh.f32 %v1023_v8  ;;  %v1024_v13 = vmul.f32 0.5, %v1023_v8 }
0x11e5   :  { %1555 = vtanh.f32 %v1024_v13 }
0x11f0   :  { %v1554_v12 = vpop.eup %1553 }
0x11f1   :  { %1031 = vrot.lane.b32.xlu0 %v1554_v12, %s1592_s0 }
0x11f2   :  { %v1556_v14 = vpop.eup %1555 }
0x11f3   :  { %v1026_v15 = vadd.f32 1.0, %v1556_v14 }
0x11f5   :  { %v1027_v16 = vmul.f32 0.5, %v1026_v15 }
0x11f7   :  { %v1029_v19 = vmul.f32 %v1027_v16, %v932_v2 }
0x1263   :  { %v1032_v17 = vpop.permute.xlu0 %1031 }
0x1264   :  { %v1034_v18 = vmul.f32 %v1032_v17, %v1027_v16 }
0x1266   :  { %1036 = vrot.lane.b32.xlu1 %v1034_v18, %s1593_s5 }
0x12d8   :  { %v1037_v20 = vpop.permute.xlu1 %1036 }
0x12d9   :  { %v1039_v21 = vadd.f32 %v1037_v20, %v1029_v19 }
0x12db   :  { %1557 = vtanh.f32 %v1039_v21 }
0x12e8   :  { %v1558_v35 = vpop.eup %1557 }
0x12e9   :  { %1042 = vrot.lane.b32.xlu0 %v1558_v35, %s1592_s0 }
0x135b   :  { %v1043_v22 = vpop.permute.xlu0 %1042 }
0x135c   :  { %v1045_v23 = vmul.f32 %v1043_v22, %v1027_v16 }
0x135e   :  { %1056 = vrot.lane.b32.xlu1 %v1045_v23, %s1593_s5 }
0x13d0   :  { %v1057_v24 = vpop.permute.xlu1 %1056 }
0x13d1   :  { %1500 = vmatmul.mubr.msk.f32.vlgmr.msra.gmra.mxu1 %vm299_vm0, %v1057_v24 }
0x1491   :  { %v1126_v27 = vpop.f32.mrf.mxu1 }
0x1492   :  { %v1130_v28 = vadd.f32 %v1126_v27, %v296_v25 }
0x1493   :  { %v1501_v36 = vpop.f32.mrf.mxu1 }
0x1494   :  { %1559 = vtanh.f32 %v1130_v28  ;;  %v1131_v39 = vmul.f32 0.5, %v1130_v28 }
0x1496   :  { %1561 = vtanh.f32 %v1131_v39 }
0x14a1   :  { %v1560_v37 = vpop.eup %1559 }
0x14a2   :  { %1138 = vrot.lane.b32.xlu0 %v1560_v37, %s1592_s0 }
0x14a3   :  { %v1562_v41 = vpop.eup %1561 }
0x14a4   :  { %v1133_v43 = vadd.f32 1.0, %v1562_v41 }
0x14a6   :  { %401 = vrot.lane.b32.xlu0 %v1819_v38, %s1594_s6  ;;  %v1134_v45 = vmul.f32 0.5, %v1133_v43 }
0x14a8   :  { %v1136_v51 = vmul.f32 %v1134_v45, %v1039_v21 }
0x1514   :  { %v1139_v46 = vpop.permute.xlu0 %1138 }
0x1515   :  { %v1141_v10 = vmul.f32 %v1139_v46, %v1134_v45 }
0x1517   :  { %1143 = vrot.lane.b32.xlu1 %v1141_v10, %s1593_s5 }
0x1518   :  { %v402_v34 = vpop.permute.xlu0 %401 }
0x1519   :  { %v404_v47 = vmul.f32 %v402_v34, %v1698_v26  ;;  %v618_v48 = vmul.f32 %v1746_v9, %v402_v34  ;;  %v832_v49 = vmul.f32 %v1785_v56, %v402_v34  ;;  %v1046_v50 = vmul.f32 %v1045_v23, %v402_v34 }
0x151a   :  { %v511_v57 = vmul.f32 %v1727_v55, %v402_v34  ;;  %v725_v58 = vmul.f32 %v1766_v29, %v402_v34  ;;  %v939_v59 = vmul.f32 %v1804_v4, %v402_v34 }
0x151b   :  { %406 = vrot.lane.b32.xlu0 %v404_v47, %s1593_s5 }
0x151f   :  { %620 = vrot.lane.b32.xlu0 %v618_v48, %s1593_s5 }
0x1523   :  { %834 = vrot.lane.b32.xlu0 %v832_v49, %s1593_s5 }
0x1527   :  { %1048 = vrot.lane.b32.xlu0 %v1046_v50, %s1593_s5 }
0x1589   :  { %v1144_v52 = vpop.permute.xlu1 %1143 }
0x158a   :  { %v1831_v53 = vadd.f32 %v1144_v52, %v1136_v51 }
0x158c   :  { %1563 = vtanh.f32 %v1831_v53 }
0x158d   :  { %v407_v26 = vpop.permute.xlu0 %406 }
0x158e   :  { %v409_v33 = vsel %vm299_vm0, %v407_v26, 0.0 }
0x158f   :  { %410 = vadd.xlane.f32.xlu0 %v409_v33 }
0x1591   :  { %v621_v9 = vpop.permute.xlu0 %620 }
0x1592   :  { %v623_v54 = vsel %vm299_vm0, %v621_v9, 0.0 }
0x1593   :  { %624 = vadd.xlane.f32.xlu0 %v623_v54 }
0x1595   :  { %v835_v29 = vpop.permute.xlu0 %834 }
0x1596   :  { %v837_v1 = vsel %vm299_vm0, %v835_v29, 0.0 }
0x1599   :  { %v1564_v56 = vpop.eup %1563  ;;  %v1049_v32 = vpop.permute.xlu0 %1048 }
0x159a   :  { %1149 = vrot.lane.b32.xlu1 %v1564_v56, %s1592_s0  ;;  %v1051_v44 = vsel %vm299_vm0, %v1049_v32, 0.0 }
0x159e   :  { %513 = vrot.lane.b32.xlu1 %v511_v57, %s1593_s5 }
0x15a2   :  { %727 = vrot.lane.b32.xlu1 %v725_v58, %s1593_s5 }
0x15a6   :  { %941 = vrot.lane.b32.xlu1 %v939_v59, %s1593_s5 }
0x160c   :  { %v1150_v31 = vpop.permute.xlu1 %1149 }
0x160d   :  { %v1152_v60 = vmul.f32 %v1150_v31, %v1134_v45 }
0x160f   :  { %v1153_v61 = vmul.f32 %v1152_v60, %v402_v34 }
0x1610   :  { %v514_v62 = vpop.permute.xlu1 %513 }
0x1611   :  { %1155 = vrot.lane.b32.xlu1 %v1153_v61, %s1593_s5  ;;  %v516_v42 = vsel %vm299_vm0, %v514_v62, 0.0 }
0x1614   :  { %v728_v40 = vpop.permute.xlu1 %727 }
0x1615   :  { %v730_v63 = vsel %vm299_vm0, %v728_v40, 0.0 }
0x1616   :  { %731 = vadd.xlane.f32.xlu0 %v730_v63 }
0x1618   :  { %v942_v55 = vpop.permute.xlu1 %941  ;;  %v411_v2 = vpop.xlane.xlu0 %410 }
0x1619   :  { %v944_v0 = vsel %vm299_vm0, %v942_v55, 0.0  ;;  %v412_v30 = vadd.f32 %v1819_v38, %v411_v2 }
0x161a   :  { %945 = vadd.xlane.f32.xlu0 %v944_v0 }
0x161c   :  { %v625_v3 = vpop.xlane.xlu0 %624 }
0x161d   :  { %v626_v4 = vadd.f32 %v1819_v38, %v625_v3 }
0x1635   :  { %517 = vadd.xlane.f32.xlu1 %v516_v42 }
0x1639   :  { %838 = vadd.xlane.f32.xlu1 %v837_v1 }
0x163d   :  { %1052 = vadd.xlane.f32.xlu1 %v1051_v44 }
0x164e   :  { %1163 = vrot.lane.b32.xlu1 %v412_v30, %s1594_s6 }
0x1652   :  { %1171 = vrot.lane.b32.xlu1 %v626_v4, %s1595_s7 }
0x1683   :  { %v1156_v5 = vpop.permute.xlu1 %1155 }
0x1684   :  { %v1158_v6 = vsel %vm299_vm0, %v1156_v5, 0.0 }
0x1685   :  { %1159 = vadd.xlane.f32.xlu0 %v1158_v6 }
0x169f   :  { %v732_v7 = vpop.xlane.xlu0 %731 }
0x16a0   :  { %v733_v8 = vadd.f32 %v1819_v38, %v732_v7 }
0x16a2   :  { %1175 = vrot.lane.b32.xlu1 %v733_v8, %s1596_s8 }
0x16a3   :  { %v946_v11 = vpop.xlane.xlu0 %945 }
0x16a4   :  { %v947_v12 = vadd.f32 %v1819_v38, %v946_v11 }
0x16a6   :  { %1183 = vrot.lane.b32.xlu1 %v947_v12, %s1597_s9 }
0x16be   :  { %v518_v13 = vpop.xlane.xlu1 %517 }
0x16bf   :  { %v519_v14 = vadd.f32 %v1819_v38, %v518_v13 }
0x16c1   :  { %1167 = vrot.lane.b32.xlu0 %v519_v14, %s1598_s10 }
0x16c2   :  { %v839_v15 = vpop.xlane.xlu1 %838 }
0x16c3   :  { %v840_v16 = vadd.f32 %v1819_v38, %v839_v15 }
0x16c5   :  { %1179 = vrot.lane.b32.xlu0 %v840_v16, %s1599_s11 }
0x16c6   :  { %v1053_v17 = vpop.xlane.xlu1 %1052 }
0x16c7   :  { %v1054_v18 = vadd.f32 %v1819_v38, %v1053_v17 }
0x16c9   :  { %1187 = vrot.lane.b32.xlu0 %v1054_v18, %s1600_s12 }
0x16ca   :  { %v1164_v21 = vpop.permute.xlu1 %1163 }
0x16cd   :  { %1209 = vrot.lane.b32.xlu0 %v1152_v60, %s1593_s5 }
0x16ce   :  { %v1172_v22 = vpop.permute.xlu1 %1171 }
0x170e   :  { %v1160_v19 = vpop.xlane.xlu0 %1159 }
0x170f   :  { %v1161_v20 = vadd.f32 %v1819_v38, %v1160_v19 }
0x1711   :  { %1191 = vrot.lane.b32.xlu1 %v1161_v20, %s1601_s13 }
0x1714   :  { %v1176_v24 = vpop.permute.xlu1 %1175 }
0x1718   :  { %v1184_v36 = vpop.permute.xlu1 %1183 }
0x1733   :  { %v1168_v35 = vpop.permute.xlu0 %1167 }
0x1734   :  { %v1195_v23 = vsel %vm1194_vm2, %v1164_v21, %v1168_v35 }
0x1735   :  { %v1197_v25 = vsel %vm1196_vm3, %v1195_v23, %v1172_v22 }
0x1736   :  { %v1199_v28 = vsel %vm1198_vm4, %v1197_v25, %v1176_v24 }
0x1737   :  { %v1180_v27 = vpop.permute.xlu0 %1179 }
0x1738   :  { %v1201_v37 = vsel %vm1200_vm5, %v1199_v28, %v1180_v27 }
0x1739   :  { %v1203_v38 = vsel %vm1202_vm6, %v1201_v37, %v1184_v36 }
0x173b   :  { %v1188_v39 = vpop.permute.xlu0 %1187 }
0x173c   :  { %v1205_v41 = vsel %vm1204_vm7, %v1203_v38, %v1188_v39 }
0x173f   :  { %v1210_v46 = vpop.permute.xlu0 %1209 }
0x1740   :  { %v1216_v10 = vsel %vm299_vm0, %v1210_v46, %v1831_v53 }
0x1783   :  { %v1192_v43 = vpop.permute.xlu1 %1191 }
0x1784   :  { %v1207_v45 = vsel %vm1206_vm8, %v1205_v41, %v1192_v43 }
0x1785   :  { %1213 = vrot.lane.b32.xlu1 %v1207_v45, %s1592_s0 }
0x17f7   :  { %v1214_v34 = vpop.permute.xlu1 %1213 }
0x17f8   :  { %v1218_v47 = vsel %vm1217_vm9, %v1216_v10, %v1214_v34 }
0x17f9   :  { %v1220_v48 = vsel %vm1219_vm10, %v1218_v47, 0.0 }
0x17fa   :  { %1221 = vst [vmem:[%s1868_s2] sm:$0xff] %v1220_v48 }
0x17fb   :  { %1226 = vsyncpa [#allocation3], 1 }

</bundles_post_ra>
